<compile_context>
chip_gen: v6e
topology: v6e:2x2x1
jax: 0.10.0
libtpu: 0.0.40
codegen_flags: <defaults>
</compile_context>

<pallas_src>
import jax
import jax.numpy as jnp
from jax.experimental import pallas as pl
from jax.experimental.pallas import tpu as pltpu


# ---------------------------------------------------------------------------
# Kernel A: batched embedding + input-side gate pre-activation (parallel grid)
#   gi_g = (x @ we + be) @ wih_g + bih_g    for g in {r, z, n}
# ---------------------------------------------------------------------------
def embed_gates_kernel(x_ref, we_ref, be_ref,
                       wir_ref, wiz_ref, win_ref,
                       bir_ref, biz_ref, bin_ref,
                       gir_ref, giz_ref, gin_ref):
    emb = (jnp.dot(x_ref[...], we_ref[...], preferred_element_type=jnp.float32)
           + be_ref[...])
    gir_ref[...] = (jnp.dot(emb, wir_ref[...], preferred_element_type=jnp.float32)
                    + bir_ref[...]).astype(gir_ref.dtype)
    giz_ref[...] = (jnp.dot(emb, wiz_ref[...], preferred_element_type=jnp.float32)
                    + biz_ref[...]).astype(giz_ref.dtype)
    gin_ref[...] = (jnp.dot(emb, win_ref[...], preferred_element_type=jnp.float32)
                    + bin_ref[...]).astype(gin_ref.dtype)


def _embed_gates(x2d, we, be, wir, wiz, win, bir, biz, bin_, tm):
    M, V = x2d.shape
    H = we.shape[1]
    assert M % tm == 0
    row_spec = lambda c: pl.BlockSpec((tm, c), lambda m: (m, 0))
    w_spec = lambda a: pl.BlockSpec(a.shape, lambda m: (0,) * a.ndim)
    return pl.pallas_call(
        embed_gates_kernel,
        out_shape=tuple(jax.ShapeDtypeStruct((M, H), jnp.float32) for _ in range(3)),
        grid_spec=pltpu.PrefetchScalarGridSpec(
            num_scalar_prefetch=0,
            grid=(M // tm,),
            in_specs=[row_spec(V), w_spec(we), w_spec(be),
                      w_spec(wir), w_spec(wiz), w_spec(win),
                      w_spec(bir), w_spec(biz), w_spec(bin_)],
            out_specs=[row_spec(H), row_spec(H), row_spec(H)],
        ),
        compiler_params=pltpu.CompilerParams(
            dimension_semantics=("parallel",)),
    )(x2d, we, be, wir, wiz, win, bir, biz, bin_)


# ---------------------------------------------------------------------------
# Kernel B: sequential GRU recurrence (time-chunked grid, h carried in VMEM)
#   Only gh = h @ whh_g + bhh_g remains inside the time loop.
# ---------------------------------------------------------------------------
def gru_seq_kernel(gir_ref, giz_ref, gin_ref, state_ref,
                   whr_ref, whz_ref, whn_ref,
                   bhr_ref, bhz_ref, bhn_ref,
                   hseq_ref, enc_ref, h_scr):
    t = pl.program_id(0)
    B, H = h_scr.shape
    Tc = hseq_ref.shape[0]

    @pl.when(t == 0)
    def _():
        h_scr[...] = state_ref[0]

    # Load weights / broadcast biases once per chunk (hoisted out of the
    # unrolled inner loop; JAX does not CSE broadcast_in_dim).
    whr = whr_ref[...]
    whz = whz_ref[...]
    whn = whn_ref[...]
    bhr = jnp.broadcast_to(bhr_ref[...], (B, H))
    bhz = jnp.broadcast_to(bhz_ref[...], (B, H))
    bhn = jnp.broadcast_to(bhn_ref[...], (B, H))

    def step(i, h):
        ghr = jnp.dot(h, whr, preferred_element_type=jnp.float32) + bhr
        ghz = jnp.dot(h, whz, preferred_element_type=jnp.float32) + bhz
        ghn = jnp.dot(h, whn, preferred_element_type=jnp.float32) + bhn
        r = jax.nn.sigmoid(gir_ref[i] + ghr)
        z = jax.nn.sigmoid(giz_ref[i] + ghz)
        n = jnp.tanh(gin_ref[i] + r * ghn)
        h_new = (1.0 - z) * n + z * h
        hseq_ref[i] = h_new
        return h_new

    h_last = jax.lax.fori_loop(0, Tc, step, h_scr[...], unroll=True)
    h_scr[...] = h_last

    # Write the encoder state only once, on the final time chunk.
    @pl.when(t == pl.num_programs(0) - 1)
    def _():
        enc_ref[0] = h_last.astype(enc_ref.dtype)


def _gru_scan(gi_r, gi_z, gi_n, state, whr, whz, whn, bhr, bhz, bhn, tc):
    T, B, H = gi_r.shape
    assert T % tc == 0
    seq_spec = pl.BlockSpec((tc, B, H), lambda t: (t, 0, 0))
    res_spec = pl.BlockSpec((1, B, H), lambda t: (0, 0, 0))
    w_spec = lambda a: pl.BlockSpec(a.shape, lambda t: (0,) * a.ndim)
    return pl.pallas_call(
        gru_seq_kernel,
        out_shape=(jax.ShapeDtypeStruct((T, B, H), jnp.float32),   # h sequence
                   jax.ShapeDtypeStruct((1, B, H), jnp.float32)),  # enc
        grid_spec=pltpu.PrefetchScalarGridSpec(
            num_scalar_prefetch=0,
            grid=(T // tc,),
            in_specs=[seq_spec, seq_spec, seq_spec, res_spec,
                      w_spec(whr), w_spec(whz), w_spec(whn),
                      w_spec(bhr), w_spec(bhz), w_spec(bhn)],
            out_specs=[seq_spec, res_spec],
            scratch_shapes=[pltpu.VMEM((B, H), jnp.float32)],      # carried h
        ),
        compiler_params=pltpu.CompilerParams(
            dimension_semantics=("arbitrary",)),                   # sequential time
    )(gi_r, gi_z, gi_n, state, whr, whz, whn, bhr, bhz, bhn)


# ---------------------------------------------------------------------------
# Kernel C: batched prediction matmul, tiled over rows and vocab (parallel)
# ---------------------------------------------------------------------------
def predict_kernel(h_ref, wp_ref, bp_ref, out_ref):
    out_ref[...] = (jnp.dot(h_ref[...], wp_ref[...],
                            preferred_element_type=jnp.float32)
                    + bp_ref[...]).astype(out_ref.dtype)


def _predict(h2d, wp, bp, tm, tn):
    M, H = h2d.shape
    V = wp.shape[1]
    assert M % tm == 0 and V % tn == 0
    return pl.pallas_call(
        predict_kernel,
        out_shape=jax.ShapeDtypeStruct((M, V), jnp.float32),
        grid_spec=pltpu.PrefetchScalarGridSpec(
            num_scalar_prefetch=0,
            grid=(M // tm, V // tn),
            in_specs=[pl.BlockSpec((tm, H), lambda m, n: (m, 0)),
                      pl.BlockSpec((H, tn), lambda m, n: (0, n)),
                      pl.BlockSpec((1, tn), lambda m, n: (0, n))],
            out_specs=pl.BlockSpec((tm, tn), lambda m, n: (m, n)),
        ),
        compiler_params=pltpu.CompilerParams(
            dimension_semantics=("parallel", "parallel")),
    )(h2d, wp, bp)


# ---------------------------------------------------------------------------
# Forward wrapper: embed/gates (batched) -> GRU scan -> predict (batched)
# ---------------------------------------------------------------------------
def decoder_forward(state, inp, params):
    """state: (1, B, H) float32; inp: (T, B, V) float32 (one-hot or dense)."""
    T, B, V = inp.shape
    _, _, H = state.shape
    we, be, wih, bih, whh, bhh, wp, bp = params

    # Split the PyTorch-packed (·, 3H) gate weights into per-gate slabs so no
    # sub-lane gate slicing happens inside the kernels (gate order: r, z, n).
    wir, wiz, win = wih[:, :H], wih[:, H:2 * H], wih[:, 2 * H:]
    bir, biz, bin_ = bih[:, :H], bih[:, H:2 * H], bih[:, 2 * H:]
    whr, whz, whn = whh[:, :H], whh[:, H:2 * H], whh[:, 2 * H:]
    bhr, bhz, bhn = bhh[:, :H], bhh[:, H:2 * H], bhh[:, 2 * H:]

    M = T * B
    tm = min(M, 256)                    # row tile for the batched matmuls
    tn = min(V, 512)                    # vocab tile for the prediction matmul
    tc = min(T, 8)                      # time chunk for the recurrence

    # --- Kernel A: batched embedding + input gates over all T*B rows -------
    x2d = inp.reshape(M, V)
    gi_r, gi_z, gi_n = _embed_gates(x2d, we, be, wir, wiz, win,
                                    bir, biz, bin_, tm)
    gi_r = gi_r.reshape(T, B, H)
    gi_z = gi_z.reshape(T, B, H)
    gi_n = gi_n.reshape(T, B, H)

    # --- Kernel B: sequential GRU recurrence --------------------------------
    h_seq, enc = _gru_scan(gi_r, gi_z, gi_n, state,
                           whr, whz, whn, bhr, bhz, bhn, tc)

    # --- Kernel C: batched prediction matmul --------------------------------
    logits2d = _predict(h_seq.reshape(M, H), wp, bp, tm, tn)
    logits = logits2d.reshape(T, B, V)

    return enc, logits


# ---------------------------------------------------------------------------
# Pure-JAX reference matching PyTorch GRU / Linear semantics
# ---------------------------------------------------------------------------
def decoder_ref(state, inp, params):
    we, be, wih, bih, whh, bhh, wp, bp = params
    H = state.shape[-1]

    def step(h, x):
        emb = x @ we + be[0]
        gi = emb @ wih + bih[0]
        gh = h @ whh + bhh[0]
        r = jax.nn.sigmoid(gi[:, :H] + gh[:, :H])
        z = jax.nn.sigmoid(gi[:, H:2 * H] + gh[:, H:2 * H])
        n = jnp.tanh(gi[:, 2 * H:] + r * gh[:, 2 * H:])
        h_new = (1.0 - z) * n + z * h
        logits = h_new @ wp + bp[0]
        return h_new, logits

    h_final, logits = jax.lax.scan(step, state[0], inp)
    return h_final[None], logits


def init_params(key, vocab_size, hid):
    """Deterministic synthetic parameters (shapes follow the nn.Module)."""
    ks = jax.random.split(key, 8)
    u = lambda k, shape, scale: jax.random.uniform(k, shape, jnp.float32, -scale, scale)
    # _embed: Linear(V -> H); stored transposed for x @ W convention.
    we = u(ks[0], (vocab_size, hid), 1.0 / jnp.sqrt(vocab_size))
    be = u(ks[1], (1, hid), 1.0 / jnp.sqrt(vocab_size))
    # _rnn: GRU(H, H) -- weight_ih/hh (3H, H) stored transposed as (H, 3H), gate order r,z,n.
    wih = u(ks[2], (hid, 3 * hid), 1.0 / jnp.sqrt(hid))
    bih = u(ks[3], (1, 3 * hid), 1.0 / jnp.sqrt(hid))
    whh = u(ks[4], (hid, 3 * hid), 1.0 / jnp.sqrt(hid))
    bhh = u(ks[5], (1, 3 * hid), 1.0 / jnp.sqrt(hid))
    # _predict: Linear(H -> V), stored transposed.
    wp = u(ks[6], (hid, vocab_size), 1.0 / jnp.sqrt(hid))
    bp = u(ks[7], (1, vocab_size), 1.0 / jnp.sqrt(hid))
    return (we, be, wih, bih, whh, bhh, wp, bp)


if __name__ == "__main__":
    # (8,128)-aligned small shapes: B>=8 sublanes, H/V multiples of 128 lanes.
    T, B, V, H = 16, 8, 128, 128   # seq_len, batch, vocab_size, hidden_size

    key = jax.random.PRNGKey(0)
    kp, ks, ki = jax.random.split(key, 3)
    params = init_params(kp, V, H)

    # Initial GRU state (num_layers=1, batch, hid) and one-hot token inputs.
    state = jax.random.normal(ks, (1, B, H), jnp.float32)
    tok = jax.random.randint(ki, (T, B), 0, V)
    inp = jax.nn.one_hot(tok, V, dtype=jnp.float32)               # (T, B, V)

    enc, logits = decoder_forward(state, inp, params)
    jax.block_until_ready((enc, logits))

    enc_r, logits_r = decoder_ref(state, inp, params)
    assert enc.shape == (1, B, H) and logits.shape == (T, B, V)
    assert jnp.allclose(enc, enc_r, atol=1e-4, rtol=1e-4)
    assert jnp.allclose(logits, logits_r, atol=1e-4, rtol=1e-4)

    print("KERNEL_OK")
</pallas_src>

<mosaic_0001>
module attributes {stable_mosaic.version = 11 : i64} {
  func.func @embed_gates_kernel(%arg0: i32, %arg1: memref<128x128xf32, #tpu.memory_space<vmem>>, %arg2: memref<128x128xf32, #tpu.memory_space<vmem>>, %arg3: memref<1x128xf32, #tpu.memory_space<vmem>>, %arg4: memref<128x128xf32, #tpu.memory_space<vmem>>, %arg5: memref<128x128xf32, #tpu.memory_space<vmem>>, %arg6: memref<128x128xf32, #tpu.memory_space<vmem>>, %arg7: memref<1x128xf32, #tpu.memory_space<vmem>>, %arg8: memref<1x128xf32, #tpu.memory_space<vmem>>, %arg9: memref<1x128xf32, #tpu.memory_space<vmem>>, %arg10: memref<128x128xf32, #tpu.memory_space<vmem>>, %arg11: memref<128x128xf32, #tpu.memory_space<vmem>>, %arg12: memref<128x128xf32, #tpu.memory_space<vmem>>) attributes {dimension_semantics = [#tpu.dimension_semantics<parallel>], iteration_bounds = array<i64: 1>, scalar_prefetch = 0 : i64, scratch_operands = 0 : i64, tpu.core_type = #tpu.core_type<tc>, window_params = [{transform_indices = @transform_0, window_bounds = array<i64: 128, 128>}, {pipeline_mode = #tpu.pipeline_mode<synchronous>, transform_indices = @transform_1, window_bounds = array<i64: 128, 128>}, {pipeline_mode = #tpu.pipeline_mode<synchronous>, transform_indices = @transform_2, window_bounds = array<i64: 1, 128>}, {pipeline_mode = #tpu.pipeline_mode<synchronous>, transform_indices = @transform_3, window_bounds = array<i64: 128, 128>}, {pipeline_mode = #tpu.pipeline_mode<synchronous>, transform_indices = @transform_4, window_bounds = array<i64: 128, 128>}, {pipeline_mode = #tpu.pipeline_mode<synchronous>, transform_indices = @transform_5, window_bounds = array<i64: 128, 128>}, {pipeline_mode = #tpu.pipeline_mode<synchronous>, transform_indices = @transform_6, window_bounds = array<i64: 1, 128>}, {pipeline_mode = #tpu.pipeline_mode<synchronous>, transform_indices = @transform_7, window_bounds = array<i64: 1, 128>}, {pipeline_mode = #tpu.pipeline_mode<synchronous>, transform_indices = @transform_8, window_bounds = array<i64: 1, 128>}, {transform_indices = @transform_9, window_bounds = array<i64: 128, 128>}, {transform_indices = @transform_10, window_bounds = array<i64: 128, 128>}, {transform_indices = @transform_11, window_bounds = array<i64: 128, 128>}]} {
    %c0 = arith.constant 0 : index
    %c0_0 = arith.constant 0 : index
    %0 = vector.load %arg1[%c0, %c0_0] : memref<128x128xf32, #tpu.memory_space<vmem>>, vector<128x128xf32>
    %c0_1 = arith.constant 0 : index
    %c0_2 = arith.constant 0 : index
    %1 = vector.load %arg2[%c0_1, %c0_2] : memref<128x128xf32, #tpu.memory_space<vmem>>, vector<128x128xf32>
    %cst = arith.constant dense<0.000000e+00> : vector<128x128xf32>
    %2 = tpu.matmul %0, %1, %cst {dimension_numbers = #tpu.dot_dimension_numbers<[1], [0], [0], [1], [0, 0, 1, 1], [], []>} : vector<128x128xf32>, vector<128x128xf32>, vector<128x128xf32> -> vector<128x128xf32>
    %c0_3 = arith.constant 0 : index
    %c0_4 = arith.constant 0 : index
    %3 = vector.load %arg3[%c0_3, %c0_4] : memref<1x128xf32, #tpu.memory_space<vmem>>, vector<1x128xf32>
    %4 = vector.broadcast %3 : vector<1x128xf32> to vector<128x128xf32>
    %5 = arith.addf %2, %4 : vector<128x128xf32>
    %c0_5 = arith.constant 0 : index
    %c0_6 = arith.constant 0 : index
    %6 = vector.load %arg4[%c0_5, %c0_6] : memref<128x128xf32, #tpu.memory_space<vmem>>, vector<128x128xf32>
    %cst_7 = arith.constant dense<0.000000e+00> : vector<128x128xf32>
    %7 = tpu.matmul %5, %6, %cst_7 {dimension_numbers = #tpu.dot_dimension_numbers<[1], [0], [0], [1], [0, 0, 1, 1], [], []>} : vector<128x128xf32>, vector<128x128xf32>, vector<128x128xf32> -> vector<128x128xf32>
    %c0_8 = arith.constant 0 : index
    %c0_9 = arith.constant 0 : index
    %8 = vector.load %arg7[%c0_8, %c0_9] : memref<1x128xf32, #tpu.memory_space<vmem>>, vector<1x128xf32>
    %9 = vector.broadcast %8 : vector<1x128xf32> to vector<128x128xf32>
    %10 = arith.addf %7, %9 : vector<128x128xf32>
    %c0_10 = arith.constant 0 : index
    %c0_11 = arith.constant 0 : index
    %11 = vector.load %arg10[%c0_10, %c0_11] : memref<128x128xf32, #tpu.memory_space<vmem>>, vector<128x128xf32>
    tpu.vector_store %arg10[%c0_10, %c0_11], %10 {strides = array<i32>} : memref<128x128xf32, #tpu.memory_space<vmem>>, vector<128x128xf32>,
    %c0_12 = arith.constant 0 : index
    %c0_13 = arith.constant 0 : index
    %12 = vector.load %arg5[%c0_12, %c0_13] : memref<128x128xf32, #tpu.memory_space<vmem>>, vector<128x128xf32>
    %cst_14 = arith.constant dense<0.000000e+00> : vector<128x128xf32>
    %13 = tpu.matmul %5, %12, %cst_14 {dimension_numbers = #tpu.dot_dimension_numbers<[1], [0], [0], [1], [0, 0, 1, 1], [], []>} : vector<128x128xf32>, vector<128x128xf32>, vector<128x128xf32> -> vector<128x128xf32>
    %c0_15 = arith.constant 0 : index
    %c0_16 = arith.constant 0 : index
    %14 = vector.load %arg8[%c0_15, %c0_16] : memref<1x128xf32, #tpu.memory_space<vmem>>, vector<1x128xf32>
    %15 = vector.broadcast %14 : vector<1x128xf32> to vector<128x128xf32>
    %16 = arith.addf %13, %15 : vector<128x128xf32>
    %c0_17 = arith.constant 0 : index
    %c0_18 = arith.constant 0 : index
    %17 = vector.load %arg11[%c0_17, %c0_18] : memref<128x128xf32, #tpu.memory_space<vmem>>, vector<128x128xf32>
    tpu.vector_store %arg11[%c0_17, %c0_18], %16 {strides = array<i32>} : memref<128x128xf32, #tpu.memory_space<vmem>>, vector<128x128xf32>,
    %c0_19 = arith.constant 0 : index
    %c0_20 = arith.constant 0 : index
    %18 = vector.load %arg6[%c0_19, %c0_20] : memref<128x128xf32, #tpu.memory_space<vmem>>, vector<128x128xf32>
    %cst_21 = arith.constant dense<0.000000e+00> : vector<128x128xf32>
    %19 = tpu.matmul %5, %18, %cst_21 {dimension_numbers = #tpu.dot_dimension_numbers<[1], [0], [0], [1], [0, 0, 1, 1], [], []>} : vector<128x128xf32>, vector<128x128xf32>, vector<128x128xf32> -> vector<128x128xf32>
    %c0_22 = arith.constant 0 : index
    %c0_23 = arith.constant 0 : index
    %20 = vector.load %arg9[%c0_22, %c0_23] : memref<1x128xf32, #tpu.memory_space<vmem>>, vector<1x128xf32>
    %21 = vector.broadcast %20 : vector<1x128xf32> to vector<128x128xf32>
    %22 = arith.addf %19, %21 : vector<128x128xf32>
    %c0_24 = arith.constant 0 : index
    %c0_25 = arith.constant 0 : index
    %23 = vector.load %arg12[%c0_24, %c0_25] : memref<128x128xf32, #tpu.memory_space<vmem>>, vector<128x128xf32>
    tpu.vector_store %arg12[%c0_24, %c0_25], %22 {strides = array<i32>} : memref<128x128xf32, #tpu.memory_space<vmem>>, vector<128x128xf32>,
    return
  }
  func.func @transform_0(%arg0: i32) -> (i32, i32) {
    %c0_i32 = arith.constant 0 : i32
    %c0_i32_0 = arith.constant 0 : i32
    return %arg0, %c0_i32 : i32, i32
  }
  func.func @transform_1(%arg0: i32) -> (i32, i32) {
    %c0_i32 = arith.constant 0 : i32
    %c0_i32_0 = arith.constant 0 : i32
    %c0_i32_1 = arith.constant 0 : i32
    return %c0_i32, %c0_i32_0 : i32, i32
  }
  func.func @transform_2(%arg0: i32) -> (i32, i32) {
    %c0_i32 = arith.constant 0 : i32
    %c0_i32_0 = arith.constant 0 : i32
    %c0_i32_1 = arith.constant 0 : i32
    return %c0_i32, %c0_i32_0 : i32, i32
  }
  func.func @transform_3(%arg0: i32) -> (i32, i32) {
    %c0_i32 = arith.constant 0 : i32
    %c0_i32_0 = arith.constant 0 : i32
    %c0_i32_1 = arith.constant 0 : i32
    return %c0_i32, %c0_i32_0 : i32, i32
  }
  func.func @transform_4(%arg0: i32) -> (i32, i32) {
    %c0_i32 = arith.constant 0 : i32
    %c0_i32_0 = arith.constant 0 : i32
    %c0_i32_1 = arith.constant 0 : i32
    return %c0_i32, %c0_i32_0 : i32, i32
  }
  func.func @transform_5(%arg0: i32) -> (i32, i32) {
    %c0_i32 = arith.constant 0 : i32
    %c0_i32_0 = arith.constant 0 : i32
    %c0_i32_1 = arith.constant 0 : i32
    return %c0_i32, %c0_i32_0 : i32, i32
  }
  func.func @transform_6(%arg0: i32) -> (i32, i32) {
    %c0_i32 = arith.constant 0 : i32
    %c0_i32_0 = arith.constant 0 : i32
    %c0_i32_1 = arith.constant 0 : i32
    return %c0_i32, %c0_i32_0 : i32, i32
  }
  func.func @transform_7(%arg0: i32) -> (i32, i32) {
    %c0_i32 = arith.constant 0 : i32
    %c0_i32_0 = arith.constant 0 : i32
    %c0_i32_1 = arith.constant 0 : i32
    return %c0_i32, %c0_i32_0 : i32, i32
  }
  func.func @transform_8(%arg0: i32) -> (i32, i32) {
    %c0_i32 = arith.constant 0 : i32
    %c0_i32_0 = arith.constant 0 : i32
    %c0_i32_1 = arith.constant 0 : i32
    return %c0_i32, %c0_i32_0 : i32, i32
  }
  func.func @transform_9(%arg0: i32) -> (i32, i32) {
    %c0_i32 = arith.constant 0 : i32
    %c0_i32_0 = arith.constant 0 : i32
    return %arg0, %c0_i32 : i32, i32
  }
  func.func @transform_10(%arg0: i32) -> (i32, i32) {
    %c0_i32 = arith.constant 0 : i32
    %c0_i32_0 = arith.constant 0 : i32
    return %arg0, %c0_i32 : i32, i32
  }
  func.func @transform_11(%arg0: i32) -> (i32, i32) {
    %c0_i32 = arith.constant 0 : i32
    %c0_i32_0 = arith.constant 0 : i32
    return %arg0, %c0_i32 : i32, i32
  }
}

</mosaic_0001>

<bundles_post_ra>
// kernel: tpu_custom_call.1
= control target key start
LH: loop header
LB: loop body
LE: loop exit
PB: predicated region body
PF: predicated region fallthrough
CT: control target
= control target key end

     0   :  { %17 = vsyncpa [#allocation3], 0  ;;  %s1674_s0 = inlined_call_operand.hbm [shape: f32[128,128], index: 0, kind: input, shape index: {}]   ;;  %s1675_s1 = inlined_call_operand.hbm [shape: f32[128,128], index: 1, kind: input, shape index: {}]   ;;  %s1676_s2 = inlined_call_operand.vmem [shape: f32[1,128], index: 2, kind: input, shape index: {}]   ;;  %s1677_s3 = inlined_call_operand.hbm [shape: f32[128,128], index: 3, kind: input, shape index: {}]   ;;  %s1678_s4 = inlined_call_operand.hbm [shape: f32[128,128], index: 4, kind: input, shape index: {}]   ;;  %s1679_s5 = inlined_call_operand.hbm [shape: f32[128,128], index: 5, kind: input, shape index: {}]   ;;  %s1680_s6 = inlined_call_operand.vmem [shape: f32[1,128], index: 6, kind: input, shape index: {}]   ;;  %s1681_s7 = inlined_call_operand.vmem [shape: f32[1,128], index: 7, kind: input, shape index: {}]   ;;  %s1682_s8 = inlined_call_operand.vmem [shape: f32[1,128], index: 8, kind: input, shape index: {}]   ;;  %s1683_s9 = inlined_call_operand.hbm [shape: f32[128,128], index: 9, kind: output, shape index: {0}]   ;;  %s1684_s10 = inlined_call_operand.hbm [shape: f32[128,128], index: 10, kind: output, shape index: {1}]   ;;  %s1685_s11 = inlined_call_operand.hbm [shape: f32[128,128], index: 11, kind: output, shape index: {2}]  }
   0x1   :  { %18 = vsyncpa [#allocation6], 0 }
   0x2   :  { %19 = vsyncpa [#allocation9], 0 }
   0x3   :  { %20 = vsyncpa [#allocation4], 0 }
   0x4   :  { %21 = vsyncpa [#allocation13], 0  ;;  %s1427_s17 = smov [#allocation5]   ;;  %s1428_s19 = smov [#allocation8]  }
   0x5   :  { %s39_s18 = sshll.u32 %s1427_s17, 4  ;;  %s65_s20 = sshll.u32 %s1428_s19, 4  ;;  %s40_s18 = int_to_ptr.vmem [resolvable:$true] %s39_s18  ;;  %s66_s20 = int_to_ptr.vmem [resolvable:$true] %s65_s20 }
   0x6   :  { %s1265_s21 = scalar_lea.vmem %s40_s18, 2048  ;;  %p1270_p1 = scmp.lt.s32.totalorder %s40_s18, %s40_s18 }
   0x7   :  { %p1266_p0 = scmp.ne.s32.totalorder %s40_s18, %s1265_s21  ;;  %p1271_p2 = scmp.lt.s32.totalorder %s1265_s21, %s1265_s21 }
   0x9   :  { %p1272_p3 = por %p1271_p2, %p1270_p1 }
   0xb   :  { %p1273_p4 = pnand %p1272_p3, %p1266_p0 }
   0xd   :  { %1276 = shalt.err (!%p1273_p4)
}
   0xe   :  { %s1429_s22 = smov 128   ;;  %s1430_s23 = smov 8  }
   0xf   :  { %45 = dma.hbm_to_vmem [thread:$0]  %s1675_s1, 2048, %s40_s18, [#allocation6], %s1429_s22, %s1429_s22, %s1430_s23  }
  0x10   :  { %s1285_s26 = scalar_lea.vmem %s66_s20, 2048  ;;  %p1290_p6 = scmp.lt.s32.totalorder %s66_s20, %s66_s20 }
  0x11   :  { %p1286_p5 = scmp.ne.s32.totalorder %s66_s20, %s1285_s26  ;;  %p1291_p7 = scmp.lt.s32.totalorder %s1285_s26, %s1285_s26 }
  0x13   :  { %p1292_p8 = por %p1291_p7, %p1290_p6 }
  0x15   :  { %p1293_p9 = pnand %p1292_p8, %p1286_p5 }
  0x17   :  { %1296 = shalt.err (!%p1293_p9)
}
  0x18   :  { %71 = dma.hbm_to_vmem [thread:$0]  %s1678_s4, 2048, %s66_s20, [#allocation9], %s1429_s22, %s1429_s22, %s1430_s23  }
  0x19   :  { %s1431_s29 = smov [#allocation2]   ;;  %s1432_s12 = smov [#allocation7]  }
  0x1a   :  { %s27_s30 = sshll.u32 %s1431_s29, 4  ;;  %s53_s13 = sshll.u32 %s1432_s12, 4  ;;  %s28_s30 = int_to_ptr.vmem [resolvable:$true] %s27_s30  ;;  %s54_s13 = int_to_ptr.vmem [resolvable:$true] %s53_s13 }
  0x1b   :  { %s1305_s1 = scalar_lea.vmem %s28_s30, 2048  ;;  %p1310_p11 = scmp.lt.s32.totalorder %s28_s30, %s28_s30 }
  0x1c   :  { %p1306_p10 = scmp.ne.s32.totalorder %s28_s30, %s1305_s1  ;;  %p1311_p12 = scmp.lt.s32.totalorder %s1305_s1, %s1305_s1 }
  0x1e   :  { %p1312_p13 = por %p1311_p12, %p1310_p11 }
  0x20   :  { %p1313_p0 = pnand %p1312_p13, %p1306_p10 }
  0x22   :  { %1316 = shalt.err (!%p1313_p0)
}
  0x23   :  { %33 = dma.hbm_to_vmem [thread:$0]  %s1674_s0, 2048, %s28_s30, [#allocation3], %s1429_s22, %s1429_s22, %s1430_s23  }
  0x24   :  { %s1325_s4 = scalar_lea.vmem %s54_s13, 2048  ;;  %p1330_p2 = scmp.lt.s32.totalorder %s54_s13, %s54_s13 }
  0x25   :  { %p1326_p1 = scmp.ne.s32.totalorder %s54_s13, %s1325_s4  ;;  %p1331_p3 = scmp.lt.s32.totalorder %s1325_s4, %s1325_s4 }
  0x27   :  { %p1332_p4 = por %p1331_p3, %p1330_p2 }
  0x29   :  { %p1333_p5 = pnand %p1332_p4, %p1326_p1 }
  0x2b   :  { %1336 = shalt.err (!%p1333_p5)
}
  0x2c   :  { %59 = dma.hbm_to_vmem [thread:$0]  %s1677_s3, 2048, %s54_s13, [#allocation6], %s1429_s22, %s1429_s22, %s1430_s23  }
  0x2d   :  { %s1433_s18 = smov [#allocation10]  }
  0x2e   :  { %s77_s19 = sshll.u32 %s1433_s18, 4  ;;  %s78_s19 = int_to_ptr.vmem [resolvable:$true] %s77_s19 }
  0x2f   :  { %s1345_s20 = scalar_lea.vmem %s78_s19, 2048  ;;  %p1350_p7 = scmp.lt.s32.totalorder %s78_s19, %s78_s19 }
  0x30   :  { %p1346_p6 = scmp.ne.s32.totalorder %s78_s19, %s1345_s20  ;;  %p1351_p8 = scmp.lt.s32.totalorder %s1345_s20, %s1345_s20 }
  0x32   :  { %p1352_p9 = por %p1351_p8, %p1350_p7 }
  0x34   :  { %p1353_p10 = pnand %p1352_p9, %p1346_p6 }
  0x36   :  { %1356 = shalt.err (!%p1353_p10)
}
  0x37   :  { %83 = dma.hbm_to_vmem [thread:$0]  %s1679_s5, 2048, %s78_s19, [#allocation9], %s1429_s22, %s1429_s22, %s1430_s23  }
  0x38   :  { %1417 = dma.done.wait [#allocation3], 2048  }
  0x39   :  { %1418 = vsyncadd [#allocation3], 4294965248 }
  0x3a   :  { %1419 = dma.done.wait [#allocation6], 4096  }
  0x3b   :  { %1420 = vsyncadd [#allocation6], 4294963200 }
  0x3c   :  { %1421 = dma.done.wait [#allocation9], 4096  }
  0x3d   :  { %1422 = vsyncadd [#allocation9], 4294963200  ;;  %v136_v0 = vld [vmem:[#allocation5 + $0x78] sm:$0xff]  ;;  %v135_v1 = vld [vmem:[#allocation5 + $0x70] sm:$0xff]  ;;  %s1435_s27 = smov [#allocation12]  }
  0x3e   :  { %1023 = vmatprep.subr.mxu0 %v136_v0  ;;  %v134_v2 = vld [vmem:[#allocation5 + $0x68] sm:$0xff]  ;;  %v133_v3 = vld [vmem:[#allocation5 + $0x60] sm:$0xff]  ;;  %v132_v5 = vld [vmem:[#allocation5 + $0x58] sm:$0xff]  ;;  %s858_s28 = sshll.u32 %s1435_s27, 4  ;;  %s859_s28 = int_to_ptr.vmem [resolvable:$true] %s858_s28 }
  0x3f   :  { %1024 = vmatpush3.msra.mxu0 %v136_v0  ;;  %v105_v4 = vld [vmem:[#allocation2] sm:$0xff]  ;;  %v131_v6 = vld [vmem:[#allocation5 + $0x50] sm:$0xff]  ;;  %v130_v7 = vld [vmem:[#allocation5 + $0x48] sm:$0xff] }
  0x40   :  { %1025 = vmatprep.subr.mxu0 %v135_v1  ;;  %1055 = vmatprep.mubr.f32.mxu0 %v105_v4  ;;  %v304_v8 = vld [vmem:[#allocation7 + $0x78] sm:$0xff]  ;;  %v303_v9 = vld [vmem:[#allocation7 + $0x70] sm:$0xff]  ;;  %v129_v10 = vld [vmem:[#allocation5 + $0x40] sm:$0xff] }
  0x41   :  { %1026 = vmatpush3.msra.mxu0 %v135_v1  ;;  %1079 = vmatprep.subr.mxu1 %v304_v8  ;;  %v302_v11 = vld [vmem:[#allocation7 + $0x68] sm:$0xff]  ;;  %v128_v12 = vld [vmem:[#allocation5 + $0x38] sm:$0xff]  ;;  %v301_v13 = vld [vmem:[#allocation7 + $0x60] sm:$0xff] }
  0x42   :  { %1027 = vmatprep.subr.mxu0 %v134_v2  ;;  %1080 = vmatpush3.msra.mxu1 %v304_v8  ;;  %v127_v14 = vld [vmem:[#allocation5 + $0x30] sm:$0xff]  ;;  %v300_v15 = vld [vmem:[#allocation7 + $0x58] sm:$0xff]  ;;  %v126_v16 = vld [vmem:[#allocation5 + $0x28] sm:$0xff] }
  0x43   :  { %1028 = vmatpush3.msra.mxu0 %v134_v2  ;;  %1081 = vmatprep.subr.mxu1 %v303_v9  ;;  %v299_v17 = vld [vmem:[#allocation7 + $0x50] sm:$0xff]  ;;  %v125_v18 = vld [vmem:[#allocation5 + $0x20] sm:$0xff]  ;;  %v298_v19 = vld [vmem:[#allocation7 + $0x48] sm:$0xff] }
  0x44   :  { %1029 = vmatprep.subr.mxu0 %v133_v3  ;;  %1082 = vmatpush3.msra.mxu1 %v303_v9  ;;  %v124_v20 = vld [vmem:[#allocation5 + $0x18] sm:$0xff]  ;;  %v297_v21 = vld [vmem:[#allocation7 + $0x40] sm:$0xff]  ;;  %v123_v22 = vld [vmem:[#allocation5 + $0x10] sm:$0xff] }
  0x45   :  { %1030 = vmatpush3.msra.mxu0 %v133_v3  ;;  %1083 = vmatprep.subr.mxu1 %v302_v11  ;;  %v296_v23 = vld [vmem:[#allocation7 + $0x38] sm:$0xff]  ;;  %v122_v24 = vld [vmem:[#allocation5 + $0x8] sm:$0xff]  ;;  %v295_v25 = vld [vmem:[#allocation7 + $0x30] sm:$0xff] }
  0x46   :  { %1031 = vmatprep.subr.mxu0 %v132_v5  ;;  %1084 = vmatpush3.msra.mxu1 %v302_v11  ;;  %v121_v26 = vld [vmem:[#allocation5] sm:$0xff]  ;;  %v294_v27 = vld [vmem:[#allocation7 + $0x28] sm:$0xff]  ;;  %v488_v29 = vld [vmem:[#allocation8 + $0x78] sm:$0xff] }
  0x47   :  { %1032 = vmatpush3.msra.mxu0 %v132_v5  ;;  %1085 = vmatprep.subr.mxu1 %v301_v13  ;;  %v106_v28 = vld [vmem:[#allocation2 + $0x8] sm:$0xff]  ;;  %v107_v30 = vld [vmem:[#allocation2 + $0x10] sm:$0xff]  ;;  %v293_v32 = vld [vmem:[#allocation7 + $0x20] sm:$0xff] }
  0x48   :  { %1033 = vmatprep.subr.mxu0 %v131_v6  ;;  %1086 = vmatpush3.msra.mxu1 %v301_v13  ;;  %v487_v31 = vld [vmem:[#allocation8 + $0x70] sm:$0xff]  ;;  %v108_v33 = vld [vmem:[#allocation2 + $0x18] sm:$0xff]  ;;  %v486_v34 = vld [vmem:[#allocation8 + $0x68] sm:$0xff] }
  0x49   :  { %1034 = vmatpush3.msra.mxu0 %v131_v6  ;;  %1087 = vmatprep.subr.mxu1 %v300_v15  ;;  %v109_v35 = vld [vmem:[#allocation2 + $0x20] sm:$0xff]  ;;  %v292_v37 = vld [vmem:[#allocation7 + $0x18] sm:$0xff]  ;;  %v110_v38 = vld [vmem:[#allocation2 + $0x28] sm:$0xff] }
  0x4a   :  { %1035 = vmatprep.subr.mxu0 %v130_v7  ;;  %1088 = vmatpush3.msra.mxu1 %v300_v15  ;;  %v485_v36 = vld [vmem:[#allocation8 + $0x60] sm:$0xff]  ;;  %v484_v39 = vld [vmem:[#allocation8 + $0x58] sm:$0xff]  ;;  %v111_v40 = vld [vmem:[#allocation2 + $0x30] sm:$0xff] }
  0x4b   :  { %1036 = vmatpush3.msra.mxu0 %v130_v7  ;;  %1089 = vmatprep.subr.mxu1 %v299_v17  ;;  %v483_v41 = vld [vmem:[#allocation8 + $0x50] sm:$0xff]  ;;  %v112_v43 = vld [vmem:[#allocation2 + $0x38] sm:$0xff]  ;;  %v482_v44 = vld [vmem:[#allocation8 + $0x48] sm:$0xff] }
  0x4c   :  { %1037 = vmatprep.subr.mxu0 %v129_v10  ;;  %1090 = vmatpush3.msra.mxu1 %v299_v17  ;;  %v291_v42 = vld [vmem:[#allocation7 + $0x10] sm:$0xff]  ;;  %v113_v45 = vld [vmem:[#allocation2 + $0x40] sm:$0xff]  ;;  %v114_v47 = vld [vmem:[#allocation2 + $0x48] sm:$0xff] }
  0x4d   :  { %1038 = vmatpush3.msra.mxu0 %v129_v10  ;;  %1091 = vmatprep.subr.mxu1 %v298_v19  ;;  %v481_v46 = vld [vmem:[#allocation8 + $0x40] sm:$0xff]  ;;  %v480_v48 = vld [vmem:[#allocation8 + $0x38] sm:$0xff]  ;;  %v115_v49 = vld [vmem:[#allocation2 + $0x50] sm:$0xff] }
  0x4e   :  { %1039 = vmatprep.subr.mxu0 %v128_v12  ;;  %1092 = vmatpush3.msra.mxu1 %v298_v19  ;;  %v479_v50 = vld [vmem:[#allocation8 + $0x30] sm:$0xff]  ;;  %v116_v51 = vld [vmem:[#allocation2 + $0x58] sm:$0xff]  ;;  %v478_v52 = vld [vmem:[#allocation8 + $0x28] sm:$0xff] }
  0x4f   :  { %1040 = vmatpush3.msra.mxu0 %v128_v12  ;;  %1093 = vmatprep.subr.mxu1 %v297_v21  ;;  %v117_v53 = vld [vmem:[#allocation2 + $0x60] sm:$0xff]  ;;  %v118_v55 = vld [vmem:[#allocation2 + $0x68] sm:$0xff]  ;;  %v476_v56 = vld [vmem:[#allocation8 + $0x18] sm:$0xff] }
  0x50   :  { %1041 = vmatprep.subr.mxu0 %v127_v14  ;;  %1094 = vmatpush3.msra.mxu1 %v297_v21  ;;  %v477_v54 = vld [vmem:[#allocation8 + $0x20] sm:$0xff]  ;;  %v119_v57 = vld [vmem:[#allocation2 + $0x70] sm:$0xff]  ;;  %v120_v58 = vld [vmem:[#allocation2 + $0x78] sm:$0xff] }
  0x51   :  { %1042 = vmatpush3.msra.mxu0 %v127_v14  ;;  %1095 = vmatprep.subr.mxu1 %v296_v23  ;;  %v475_v59 = vld [vmem:[#allocation8 + $0x10] sm:$0xff]  ;;  %v290_v60 = vld [vmem:[#allocation7 + $0x8] sm:$0xff]  ;;  %v289_v62 = vld [vmem:[#allocation7] sm:$0xff] }
  0x52   :  { %1043 = vmatprep.subr.mxu0 %v126_v16  ;;  %1096 = vmatpush3.msra.mxu1 %v296_v23  ;;  %v474_v61 = vld [vmem:[#allocation8 + $0x8] sm:$0xff]  ;;  %v473_v63 = vld [vmem:[#allocation8] sm:$0xff]  ;;  %v672_v0 = vld [vmem:[#allocation10 + $0x78] sm:$0xff] }
  0x53   :  { %1044 = vmatpush3.msra.mxu0 %v126_v16  ;;  %1097 = vmatprep.subr.mxu1 %v295_v25  ;;  %v1530_v2 = vld [vmem:[%s1676_s2] ss:$0 sm:$0xff]  ;;  %v671_v7 = vld [vmem:[#allocation10 + $0x70] sm:$0xff]  ;;  %v670_v10 = vld [vmem:[#allocation10 + $0x68] sm:$0xff] }
  0x54   :  { %1045 = vmatprep.subr.mxu0 %v125_v18  ;;  %1098 = vmatpush3.msra.mxu1 %v295_v25  ;;  %v669_v14 = vld [vmem:[#allocation10 + $0x60] sm:$0xff]  ;;  %v668_v17 = vld [vmem:[#allocation10 + $0x58] sm:$0xff]  ;;  %v666_v23 = vld [vmem:[#allocation10 + $0x48] sm:$0xff] }
  0x55   :  { %1046 = vmatpush3.msra.mxu0 %v125_v18  ;;  %1099 = vmatprep.subr.mxu1 %v294_v27 }
  0x56   :  { %1047 = vmatprep.subr.mxu0 %v124_v20  ;;  %1100 = vmatpush3.msra.mxu1 %v294_v27 }
  0x57   :  { %1048 = vmatpush3.msra.mxu0 %v124_v20  ;;  %1101 = vmatprep.subr.mxu1 %v293_v32  ;;  %v667_v20 = vld [vmem:[#allocation10 + $0x50] sm:$0xff] }
  0x58   :  { %1049 = vmatprep.subr.mxu0 %v123_v22  ;;  %1102 = vmatpush3.msra.mxu1 %v293_v32  ;;  %v663_v32 = vld [vmem:[#allocation10 + $0x30] sm:$0xff] }
  0x59   :  { %1050 = vmatpush3.msra.mxu0 %v123_v22  ;;  %1103 = vmatprep.subr.mxu1 %v292_v37 }
  0x5a   :  { %1051 = vmatprep.subr.mxu0 %v122_v24  ;;  %1104 = vmatpush3.msra.mxu1 %v292_v37 }
  0x5b   :  { %1052 = vmatpush3.msra.mxu0 %v122_v24  ;;  %1105 = vmatprep.subr.mxu1 %v291_v42 }
  0x5c   :  { %1053 = vmatprep.subr.mxu0 %v121_v26  ;;  %1106 = vmatpush3.msra.mxu1 %v291_v42 }
  0x5d   :  { %1054 = vmatpush3.msra.mxu0 %v121_v26  ;;  %1107 = vmatprep.subr.mxu1 %v290_v60  ;;  %v665_v26 = vld [vmem:[#allocation10 + $0x40] sm:$0xff] }
  0x5e   :  { %1056 = vmatmul.mubr.f32.vlgmr.msra.gmra.mxu0 %v106_v28  ;;  %1135 = vmatprep.subr.mxu0 %v488_v29 }
  0x5f   :  { %1058 = vmatprep.mubr.f32.mxu0 %v107_v30  ;;  %1136 = vmatpush3.msra.mxu0 %v488_v29  ;;  %v664_v29 = vld [vmem:[#allocation10 + $0x38] sm:$0xff] }
  0x60   :  { %1137 = vmatprep.subr.mxu0 %v487_v31  ;;  %1108 = vmatpush3.msra.mxu1 %v290_v60 }
  0x61   :  { %1138 = vmatpush3.msra.mxu0 %v487_v31  ;;  %1109 = vmatprep.subr.mxu1 %v289_v62 }
  0x62   :  { %1059 = vmatmul.mubr.f32.gmra.mxu0 %v108_v33  ;;  %1139 = vmatprep.subr.mxu0 %v486_v34 }
  0x63   :  { %1061 = vmatprep.mubr.f32.mxu0 %v109_v35  ;;  %1140 = vmatpush3.msra.mxu0 %v486_v34  ;;  %v662_v35 = vld [vmem:[#allocation10 + $0x28] sm:$0xff] }
  0x64   :  { %1141 = vmatprep.subr.mxu0 %v485_v36  ;;  %1110 = vmatpush3.msra.mxu1 %v289_v62 }
  0x65   :  { %1142 = vmatpush3.msra.mxu0 %v485_v36  ;;  %1191 = vmatprep.subr.mxu1 %v672_v0 }
  0x66   :  { %1062 = vmatmul.mubr.f32.gmra.mxu0 %v110_v38  ;;  %1143 = vmatprep.subr.mxu0 %v484_v39  ;;  %v661_v38 = vld [vmem:[#allocation10 + $0x20] sm:$0xff] }
  0x67   :  { %1064 = vmatprep.mubr.f32.mxu0 %v111_v40  ;;  %1144 = vmatpush3.msra.mxu0 %v484_v39 }
  0x68   :  { %1145 = vmatprep.subr.mxu0 %v483_v41 }
  0x69   :  { %1146 = vmatpush3.msra.mxu0 %v483_v41  ;;  %v660_v41 = vld [vmem:[#allocation10 + $0x18] sm:$0xff] }
  0x6a   :  { %1065 = vmatmul.mubr.f32.gmra.mxu0 %v112_v43  ;;  %1147 = vmatprep.subr.mxu0 %v482_v44 }
  0x6b   :  { %1067 = vmatprep.mubr.f32.mxu0 %v113_v45  ;;  %1148 = vmatpush3.msra.mxu0 %v482_v44  ;;  %v659_v44 = vld [vmem:[#allocation10 + $0x10] sm:$0xff] }
  0x6c   :  { %1149 = vmatprep.subr.mxu0 %v481_v46 }
  0x6d   :  { %1150 = vmatpush3.msra.mxu0 %v481_v46  ;;  %v658_v46 = vld [vmem:[#allocation10 + $0x8] sm:$0xff] }
  0x6e   :  { %1068 = vmatmul.mubr.f32.gmra.mxu0 %v114_v47  ;;  %1151 = vmatprep.subr.mxu0 %v480_v48 }
  0x6f   :  { %1070 = vmatprep.mubr.f32.mxu0 %v115_v49  ;;  %1152 = vmatpush3.msra.mxu0 %v480_v48  ;;  %v657_v48 = vld [vmem:[#allocation10] sm:$0xff] }
  0x70   :  { %1153 = vmatprep.subr.mxu0 %v479_v50  ;;  %v1596_v49 = vld [vmem:[%s1680_s6] ss:$0 sm:$0xff]  ;;  %s1434_s6 = smov [#allocation11]  }
  0x71   :  { %1154 = vmatpush3.msra.mxu0 %v479_v50  ;;  %v1601_v50 = vld [vmem:[%s1681_s7] ss:$0 sm:$0xff]  ;;  %s846_s7 = sshll.u32 %s1434_s6, 4  ;;  %s847_s7 = int_to_ptr.vmem [resolvable:$true] %s846_s7 }
  0x72   :  { %1071 = vmatmul.mubr.f32.gmra.mxu0 %v116_v51  ;;  %1155 = vmatprep.subr.mxu0 %v478_v52  ;;  %s1357_s12 = scalar_lea.vmem %s847_s7, 2048  ;;  %p1362_p12 = scmp.lt.s32.totalorder %s847_s7, %s847_s7 }
  0x73   :  { %1073 = vmatprep.mubr.f32.mxu0 %v117_v53  ;;  %1156 = vmatpush3.msra.mxu0 %v478_v52  ;;  %p1358_p11 = scmp.ne.s32.totalorder %s847_s7, %s1357_s12  ;;  %p1363_p13 = scmp.lt.s32.totalorder %s1357_s12, %s1357_s12 }
  0x74   :  { %1157 = vmatprep.subr.mxu0 %v477_v54 }
  0x75   :  { %1158 = vmatpush3.msra.mxu0 %v477_v54  ;;  %p1364_p0 = por %p1363_p13, %p1362_p12 }
  0x76   :  { %1074 = vmatmul.mubr.f32.gmra.mxu0 %v118_v55  ;;  %1159 = vmatprep.subr.mxu0 %v476_v56 }
  0x77   :  { %1076 = vmatprep.mubr.f32.mxu0 %v119_v57  ;;  %1160 = vmatpush3.msra.mxu0 %v476_v56  ;;  %p1365_p1 = pnand %p1364_p0, %p1358_p11 }
  0x78   :  { %1161 = vmatprep.subr.mxu0 %v475_v59 }
  0x79   :  { %1162 = vmatpush3.msra.mxu0 %v475_v59 }
  0x7a   :  { %1077 = vmatmul.mubr.f32.gmra.mxu0 %v120_v58  ;;  %1163 = vmatprep.subr.mxu0 %v474_v61 }
  0x7b   :  { %1164 = vmatpush3.msra.mxu0 %v474_v61 }
  0x7c   :  { %1165 = vmatprep.subr.mxu0 %v473_v63 }
  0x7d   :  { %1166 = vmatpush3.msra.mxu0 %v473_v63 }
 0x11e   :  { %v1057_v1 = vpop.f32.mrf.mxu0 }
 0x11f   :  { %v1536_v5 = vadd.f32 %v1057_v1, %v1530_v2 }
 0x120   :  { %v210_v3 = vpop.f32.mrf.mxu0 }
 0x121   :  { %v1533_v4 = vadd.f32 %v1530_v2, %v210_v3 }
 0x122   :  { %v1060_v6 = vpop.f32.mrf.mxu0 }
 0x123   :  { %1111 = vmatprep.mubr.f32.mxu1 %v1533_v4  ;;  %1167 = vmatprep.mubr.f32.mxu0 %v1533_v4  ;;  %v1546_v12 = vadd.f32 %v1060_v6, %v1530_v2 }
 0x124   :  { %v220_v8 = vpop.f32.mrf.mxu0  ;;  %1112 = vmatmul.mubr.f32.vlgmr.msra.gmra.mxu1 %v1536_v5  ;;  %1168 = vmatmul.mubr.f32.vlgmr.msra.gmra.mxu0 %v1536_v5 }
 0x125   :  { %v1543_v9 = vadd.f32 %v1530_v2, %v220_v8  ;;  %1192 = vmatpush3.msra.mxu1 %v672_v0 }
 0x126   :  { %1193 = vmatprep.subr.mxu1 %v671_v7  ;;  %v1063_v11 = vpop.f32.mrf.mxu0 }
 0x127   :  { %1194 = vmatpush3.msra.mxu1 %v671_v7  ;;  %1114 = vmatprep.mubr.f32.mxu1 %v1543_v9  ;;  %v1556_v18 = vadd.f32 %v1063_v11, %v1530_v2 }
 0x128   :  { %1170 = vmatprep.mubr.f32.mxu0 %v1543_v9  ;;  %1195 = vmatprep.subr.mxu1 %v670_v10  ;;  %v230_v13 = vpop.f32.mrf.mxu0 }
 0x129   :  { %v1551_v15 = vadd.f32 %v1530_v2, %v230_v13  ;;  %1115 = vmatmul.mubr.f32.gmra.mxu1 %v1546_v12  ;;  %1171 = vmatmul.mubr.f32.gmra.mxu0 %v1546_v12 }
 0x12a   :  { %1196 = vmatpush3.msra.mxu1 %v670_v10  ;;  %v1066_v16 = vpop.f32.mrf.mxu0 }
 0x12b   :  { %1197 = vmatprep.subr.mxu1 %v669_v14  ;;  %1117 = vmatprep.mubr.f32.mxu1 %v1551_v15  ;;  %v1566_v24 = vadd.f32 %v1066_v16, %v1530_v2 }
 0x12c   :  { %1198 = vmatpush3.msra.mxu1 %v669_v14  ;;  %1173 = vmatprep.mubr.f32.mxu0 %v1551_v15  ;;  %v240_v19 = vpop.f32.mrf.mxu0 }
 0x12d   :  { %1199 = vmatprep.subr.mxu1 %v668_v17  ;;  %v1561_v21 = vadd.f32 %v1530_v2, %v240_v19  ;;  %1118 = vmatmul.mubr.f32.gmra.mxu1 %v1556_v18 }
 0x12e   :  { %1174 = vmatmul.mubr.f32.gmra.mxu0 %v1556_v18  ;;  %1200 = vmatpush3.msra.mxu1 %v668_v17  ;;  %v1069_v22 = vpop.f32.mrf.mxu0 }
 0x12f   :  { %1201 = vmatprep.subr.mxu1 %v667_v20  ;;  %1120 = vmatprep.mubr.f32.mxu1 %v1561_v21  ;;  %v256_v30 = vadd.f32 %v1069_v22, %v1530_v2 }
 0x130   :  { %1202 = vmatpush3.msra.mxu1 %v667_v20  ;;  %1176 = vmatprep.mubr.f32.mxu0 %v1561_v21  ;;  %v250_v25 = vpop.f32.mrf.mxu0 }
 0x131   :  { %1203 = vmatprep.subr.mxu1 %v666_v23  ;;  %v1571_v27 = vadd.f32 %v1530_v2, %v250_v25  ;;  %1121 = vmatmul.mubr.f32.gmra.mxu1 %v1566_v24 }
 0x132   :  { %1177 = vmatmul.mubr.f32.gmra.mxu0 %v1566_v24  ;;  %1204 = vmatpush3.msra.mxu1 %v666_v23  ;;  %v1072_v28 = vpop.f32.mrf.mxu0 }
 0x133   :  { %1205 = vmatprep.subr.mxu1 %v665_v26  ;;  %1123 = vmatprep.mubr.f32.mxu1 %v1571_v27  ;;  %v266_v36 = vadd.f32 %v1072_v28, %v1530_v2 }
 0x134   :  { %1206 = vmatpush3.msra.mxu1 %v665_v26  ;;  %1179 = vmatprep.mubr.f32.mxu0 %v1571_v27  ;;  %v260_v31 = vpop.f32.mrf.mxu0 }
 0x135   :  { %1207 = vmatprep.subr.mxu1 %v664_v29  ;;  %v261_v33 = vadd.f32 %v1530_v2, %v260_v31  ;;  %1124 = vmatmul.mubr.f32.gmra.mxu1 %v256_v30 }
 0x136   :  { %1180 = vmatmul.mubr.f32.gmra.mxu0 %v256_v30  ;;  %1208 = vmatpush3.msra.mxu1 %v664_v29  ;;  %v1075_v34 = vpop.f32.mrf.mxu0 }
 0x137   :  { %1209 = vmatprep.subr.mxu1 %v663_v32  ;;  %1126 = vmatprep.mubr.f32.mxu1 %v261_v33  ;;  %v276_v42 = vadd.f32 %v1075_v34, %v1530_v2 }
 0x138   :  { %1210 = vmatpush3.msra.mxu1 %v663_v32  ;;  %1182 = vmatprep.mubr.f32.mxu0 %v261_v33  ;;  %v270_v37 = vpop.f32.mrf.mxu0 }
 0x139   :  { %1211 = vmatprep.subr.mxu1 %v662_v35  ;;  %v271_v39 = vadd.f32 %v1530_v2, %v270_v37  ;;  %1127 = vmatmul.mubr.f32.gmra.mxu1 %v266_v36 }
 0x13a   :  { %1183 = vmatmul.mubr.f32.gmra.mxu0 %v266_v36  ;;  %1212 = vmatpush3.msra.mxu1 %v662_v35  ;;  %v1078_v40 = vpop.f32.mrf.mxu0 }
 0x13b   :  { %1213 = vmatprep.subr.mxu1 %v661_v38  ;;  %1129 = vmatprep.mubr.f32.mxu1 %v271_v39  ;;  %v286_v47 = vadd.f32 %v1078_v40, %v1530_v2 }
 0x13c   :  { %1214 = vmatpush3.msra.mxu1 %v661_v38  ;;  %1185 = vmatprep.mubr.f32.mxu0 %v271_v39  ;;  %v280_v43 = vpop.f32.mrf.mxu0 }
 0x13d   :  { %1215 = vmatprep.subr.mxu1 %v660_v41  ;;  %v281_v45 = vadd.f32 %v1530_v2, %v280_v43  ;;  %1130 = vmatmul.mubr.f32.gmra.mxu1 %v276_v42 }
 0x13e   :  { %1186 = vmatmul.mubr.f32.gmra.mxu0 %v276_v42  ;;  %1216 = vmatpush3.msra.mxu1 %v660_v41 }
 0x13f   :  { %1217 = vmatprep.subr.mxu1 %v659_v44  ;;  %1132 = vmatprep.mubr.f32.mxu1 %v281_v45 }
 0x140   :  { %1218 = vmatpush3.msra.mxu1 %v659_v44  ;;  %1188 = vmatprep.mubr.f32.mxu0 %v281_v45 }
 0x141   :  { %1219 = vmatprep.subr.mxu1 %v658_v46  ;;  %1133 = vmatmul.mubr.f32.gmra.mxu1 %v286_v47 }
 0x142   :  { %1189 = vmatmul.mubr.f32.gmra.mxu0 %v286_v47  ;;  %1220 = vmatpush3.msra.mxu1 %v658_v46 }
 0x143   :  { %1221 = vmatprep.subr.mxu1 %v657_v48  ;;  %1223 = vmatprep.mubr.f32.mxu1 %v1533_v4 }
 0x144   :  { %1222 = vmatpush3.msra.mxu1 %v657_v48  ;;  %v1636_v48 = vld [vmem:[%s1682_s8] ss:$0 sm:$0xff] }
 0x145   :  { %1224 = vmatmul.mubr.f32.vlgmr.msra.gmra.mxu1 %v1536_v5 }
 0x146   :  { %1226 = vmatprep.mubr.f32.mxu1 %v1543_v9 }
 0x149   :  { %1227 = vmatmul.mubr.f32.gmra.mxu1 %v1546_v12 }
 0x14a   :  { %1229 = vmatprep.mubr.f32.mxu1 %v1551_v15 }
 0x14d   :  { %1230 = vmatmul.mubr.f32.gmra.mxu1 %v1556_v18 }
 0x14e   :  { %1232 = vmatprep.mubr.f32.mxu1 %v1561_v21 }
 0x151   :  { %1233 = vmatmul.mubr.f32.gmra.mxu1 %v1566_v24 }
 0x152   :  { %1235 = vmatprep.mubr.f32.mxu1 %v1571_v27 }
 0x155   :  { %1236 = vmatmul.mubr.f32.gmra.mxu1 %v256_v30 }
 0x156   :  { %1238 = vmatprep.mubr.f32.mxu1 %v261_v33 }
 0x159   :  { %1239 = vmatmul.mubr.f32.gmra.mxu1 %v266_v36 }
 0x15a   :  { %1241 = vmatprep.mubr.f32.mxu1 %v271_v39 }
 0x15d   :  { %1242 = vmatmul.mubr.f32.gmra.mxu1 %v276_v42 }
 0x15e   :  { %1244 = vmatprep.mubr.f32.mxu1 %v281_v45 }
 0x161   :  { %1245 = vmatmul.mubr.f32.gmra.mxu1 %v286_v47 }
 0x1e4   :  { %v1113_v51 = vpop.f32.mrf.mxu1  ;;  %v1169_v52 = vpop.f32.mrf.mxu0 }
 0x1e5   :  { %v384_v53 = vadd.f32 %v1113_v51, %v1596_v49  ;;  %v568_v54 = vadd.f32 %v1169_v52, %v1601_v50 }
 0x1e6   :  { %v378_v55 = vpop.f32.mrf.mxu1  ;;  %v562_v56 = vpop.f32.mrf.mxu0 }
 0x1e7   :  { %458 = vst [vmem:[#allocation11 + $0x8] sm:$0xff] %v384_v53  ;;  %642 = vst [vmem:[#allocation12 + $0x8] sm:$0xff] %v568_v54  ;;  %v379_v57 = vadd.f32 %v1596_v49, %v378_v55  ;;  %v563_v58 = vadd.f32 %v1601_v50, %v562_v56 }
 0x1e9   :  { %457 = vst [vmem:[#allocation11] sm:$0xff] %v379_v57  ;;  %641 = vst [vmem:[#allocation12] sm:$0xff] %v563_v58  ;;  %v1116_v59 = vpop.f32.mrf.mxu1  ;;  %v1172_v60 = vpop.f32.mrf.mxu0 }
 0x1ea   :  { %v394_v61 = vadd.f32 %v1116_v59, %v1596_v49  ;;  %v578_v62 = vadd.f32 %v1172_v60, %v1601_v50 }
 0x1eb   :  { %v388_v63 = vpop.f32.mrf.mxu1  ;;  %v572_v0 = vpop.f32.mrf.mxu0 }
 0x1ec   :  { %460 = vst [vmem:[#allocation11 + $0x18] sm:$0xff] %v394_v61  ;;  %644 = vst [vmem:[#allocation12 + $0x18] sm:$0xff] %v578_v62  ;;  %v389_v1 = vadd.f32 %v1596_v49, %v388_v63  ;;  %v573_v2 = vadd.f32 %v1601_v50, %v572_v0 }
 0x1ed   :  { %v1119_v3 = vpop.f32.mrf.mxu1 }
 0x1ee   :  { %459 = vst [vmem:[#allocation11 + $0x10] sm:$0xff] %v389_v1  ;;  %643 = vst [vmem:[#allocation12 + $0x10] sm:$0xff] %v573_v2  ;;  %v404_v4 = vadd.f32 %v1119_v3, %v1596_v49  ;;  %v1175_v5 = vpop.f32.mrf.mxu0 }
 0x1ef   :  { %v588_v6 = vadd.f32 %v1175_v5, %v1601_v50  ;;  %v398_v7 = vpop.f32.mrf.mxu1 }
 0x1f0   :  { %462 = vst [vmem:[#allocation11 + $0x28] sm:$0xff] %v404_v4  ;;  %v399_v8 = vadd.f32 %v1596_v49, %v398_v7  ;;  %v582_v9 = vpop.f32.mrf.mxu0 }
 0x1f1   :  { %646 = vst [vmem:[#allocation12 + $0x28] sm:$0xff] %v588_v6  ;;  %v583_v10 = vadd.f32 %v1601_v50, %v582_v9  ;;  %v1122_v11 = vpop.f32.mrf.mxu1 }
 0x1f2   :  { %461 = vst [vmem:[#allocation11 + $0x20] sm:$0xff] %v399_v8  ;;  %v414_v12 = vadd.f32 %v1122_v11, %v1596_v49  ;;  %v1178_v13 = vpop.f32.mrf.mxu0 }
 0x1f3   :  { %645 = vst [vmem:[#allocation12 + $0x20] sm:$0xff] %v583_v10  ;;  %v598_v14 = vadd.f32 %v1178_v13, %v1601_v50  ;;  %v408_v15 = vpop.f32.mrf.mxu1 }
 0x1f4   :  { %464 = vst [vmem:[#allocation11 + $0x38] sm:$0xff] %v414_v12  ;;  %v409_v16 = vadd.f32 %v1596_v49, %v408_v15  ;;  %v592_v17 = vpop.f32.mrf.mxu0 }
 0x1f5   :  { %648 = vst [vmem:[#allocation12 + $0x38] sm:$0xff] %v598_v14  ;;  %v593_v18 = vadd.f32 %v1601_v50, %v592_v17  ;;  %v1125_v19 = vpop.f32.mrf.mxu1 }
 0x1f6   :  { %463 = vst [vmem:[#allocation11 + $0x30] sm:$0xff] %v409_v16  ;;  %v424_v20 = vadd.f32 %v1125_v19, %v1596_v49  ;;  %v1181_v21 = vpop.f32.mrf.mxu0 }
 0x1f7   :  { %647 = vst [vmem:[#allocation12 + $0x30] sm:$0xff] %v593_v18  ;;  %v608_v22 = vadd.f32 %v1181_v21, %v1601_v50  ;;  %v418_v23 = vpop.f32.mrf.mxu1 }
 0x1f8   :  { %466 = vst [vmem:[#allocation11 + $0x48] sm:$0xff] %v424_v20  ;;  %v419_v24 = vadd.f32 %v1596_v49, %v418_v23  ;;  %v602_v25 = vpop.f32.mrf.mxu0 }
 0x1f9   :  { %650 = vst [vmem:[#allocation12 + $0x48] sm:$0xff] %v608_v22  ;;  %v603_v26 = vadd.f32 %v1601_v50, %v602_v25  ;;  %v1128_v27 = vpop.f32.mrf.mxu1 }
 0x1fa   :  { %465 = vst [vmem:[#allocation11 + $0x40] sm:$0xff] %v419_v24  ;;  %v434_v28 = vadd.f32 %v1128_v27, %v1596_v49  ;;  %v1184_v29 = vpop.f32.mrf.mxu0 }
 0x1fb   :  { %649 = vst [vmem:[#allocation12 + $0x40] sm:$0xff] %v603_v26  ;;  %v618_v30 = vadd.f32 %v1184_v29, %v1601_v50  ;;  %v428_v31 = vpop.f32.mrf.mxu1 }
 0x1fc   :  { %468 = vst [vmem:[#allocation11 + $0x58] sm:$0xff] %v434_v28  ;;  %v429_v32 = vadd.f32 %v1596_v49, %v428_v31  ;;  %v612_v33 = vpop.f32.mrf.mxu0 }
 0x1fd   :  { %652 = vst [vmem:[#allocation12 + $0x58] sm:$0xff] %v618_v30  ;;  %v613_v34 = vadd.f32 %v1601_v50, %v612_v33  ;;  %v1131_v35 = vpop.f32.mrf.mxu1 }
 0x1fe   :  { %467 = vst [vmem:[#allocation11 + $0x50] sm:$0xff] %v429_v32  ;;  %v444_v36 = vadd.f32 %v1131_v35, %v1596_v49  ;;  %v1187_v37 = vpop.f32.mrf.mxu0 }
 0x1ff   :  { %651 = vst [vmem:[#allocation12 + $0x50] sm:$0xff] %v613_v34  ;;  %v628_v38 = vadd.f32 %v1187_v37, %v1601_v50  ;;  %v438_v39 = vpop.f32.mrf.mxu1 }
 0x200   :  { %470 = vst [vmem:[#allocation11 + $0x68] sm:$0xff] %v444_v36  ;;  %v439_v40 = vadd.f32 %v1596_v49, %v438_v39  ;;  %v622_v41 = vpop.f32.mrf.mxu0 }
 0x201   :  { %654 = vst [vmem:[#allocation12 + $0x68] sm:$0xff] %v628_v38  ;;  %v623_v42 = vadd.f32 %v1601_v50, %v622_v41  ;;  %v1134_v43 = vpop.f32.mrf.mxu1 }
 0x202   :  { %469 = vst [vmem:[#allocation11 + $0x60] sm:$0xff] %v439_v40  ;;  %v454_v44 = vadd.f32 %v1134_v43, %v1596_v49  ;;  %v1190_v45 = vpop.f32.mrf.mxu0 }
 0x203   :  { %653 = vst [vmem:[#allocation12 + $0x60] sm:$0xff] %v623_v42  ;;  %v638_v46 = vadd.f32 %v1190_v45, %v1601_v50  ;;  %v448_v47 = vpop.f32.mrf.mxu1 }
 0x204   :  { %472 = vst [vmem:[#allocation11 + $0x78] sm:$0xff] %v454_v44  ;;  %v449_v51 = vadd.f32 %v1596_v49, %v448_v47  ;;  %v632_v52 = vpop.f32.mrf.mxu0 }
 0x205   :  { %656 = vst [vmem:[#allocation12 + $0x78] sm:$0xff] %v638_v46  ;;  %v633_v53 = vadd.f32 %v1601_v50, %v632_v52  ;;  %v1225_v54 = vpop.f32.mrf.mxu1 }
 0x206   :  { %471 = vst [vmem:[#allocation11 + $0x70] sm:$0xff] %v449_v51  ;;  %v752_v55 = vadd.f32 %v1225_v54, %v1636_v48 }
 0x207   :  { %655 = vst [vmem:[#allocation12 + $0x70] sm:$0xff] %v633_v53  ;;  %v746_v56 = vpop.f32.mrf.mxu1 }
 0x208   :  { %1368 = shalt.err (!%p1365_p1)
}
 0x209   :  { %852 = dma.vmem_to_hbm [thread:$0]  %s847_s7, 2048, %s1683_s9, [#allocation4], %s1429_s22, %s1429_s22, %s1430_s23   ;;  %826 = vst [vmem:[#allocation14 + $0x8] sm:$0xff] %v752_v55  ;;  %v747_v49 = vadd.f32 %v1636_v48, %v746_v56 }
 0x20a   :  { %s1377_s1 = scalar_lea.vmem %s859_s28, 2048  ;;  %p1382_p3 = scmp.lt.s32.totalorder %s859_s28, %s859_s28 }
 0x20b   :  { %p1378_p2 = scmp.ne.s32.totalorder %s859_s28, %s1377_s1  ;;  %p1383_p4 = scmp.lt.s32.totalorder %s1377_s1, %s1377_s1 }
 0x20d   :  { %p1384_p5 = por %p1383_p4, %p1382_p3 }
 0x20f   :  { %p1385_p6 = pnand %p1384_p5, %p1378_p2 }
 0x211   :  { %1388 = shalt.err (!%p1385_p6)
}
 0x212   :  { %864 = dma.vmem_to_hbm [thread:$0]  %s859_s28, 2048, %s1684_s10, [#allocation13], %s1429_s22, %s1429_s22, %s1430_s23   ;;  %v1228_v50 = vpop.f32.mrf.mxu1  ;;  %825 = vst [vmem:[#allocation14] sm:$0xff] %v747_v49 }
 0x213   :  { %v762_v57 = vadd.f32 %v1228_v50, %v1636_v48  ;;  %s1436_s9 = smov [#allocation14]  }
 0x214   :  { %v756_v58 = vpop.f32.mrf.mxu1  ;;  %s870_s10 = sshll.u32 %s1436_s9, 4  ;;  %s871_s10 = int_to_ptr.vmem [resolvable:$true] %s870_s10 }
 0x215   :  { %828 = vst [vmem:[#allocation14 + $0x18] sm:$0xff] %v762_v57  ;;  %v757_v59 = vadd.f32 %v1636_v48, %v756_v58  ;;  %s1397_s4 = scalar_lea.vmem %s871_s10, 2048  ;;  %p1402_p8 = scmp.lt.s32.totalorder %s871_s10, %s871_s10 }
 0x216   :  { %v1231_v60 = vpop.f32.mrf.mxu1  ;;  %p1398_p7 = scmp.ne.s32.totalorder %s871_s10, %s1397_s4  ;;  %p1403_p9 = scmp.lt.s32.totalorder %s1397_s4, %s1397_s4 }
 0x217   :  { %827 = vst [vmem:[#allocation14 + $0x10] sm:$0xff] %v757_v59  ;;  %v772_v61 = vadd.f32 %v1231_v60, %v1636_v48 }
 0x218   :  { %v766_v62 = vpop.f32.mrf.mxu1  ;;  %p1404_p10 = por %p1403_p9, %p1402_p8 }
 0x219   :  { %830 = vst [vmem:[#allocation14 + $0x28] sm:$0xff] %v772_v61  ;;  %v767_v63 = vadd.f32 %v1636_v48, %v766_v62 }
 0x21a   :  { %v1234_v0 = vpop.f32.mrf.mxu1  ;;  %p1405_p11 = pnand %p1404_p10, %p1398_p7 }
 0x21b   :  { %829 = vst [vmem:[#allocation14 + $0x20] sm:$0xff] %v767_v63  ;;  %v782_v1 = vadd.f32 %v1234_v0, %v1636_v48 }
 0x21c   :  { %v776_v2 = vpop.f32.mrf.mxu1 }
 0x21d   :  { %832 = vst [vmem:[#allocation14 + $0x38] sm:$0xff] %v782_v1  ;;  %v777_v3 = vadd.f32 %v1636_v48, %v776_v2 }
 0x21e   :  { %v1237_v4 = vpop.f32.mrf.mxu1 }
 0x21f   :  { %831 = vst [vmem:[#allocation14 + $0x30] sm:$0xff] %v777_v3  ;;  %v792_v5 = vadd.f32 %v1237_v4, %v1636_v48 }
 0x220   :  { %v786_v6 = vpop.f32.mrf.mxu1 }
 0x221   :  { %834 = vst [vmem:[#allocation14 + $0x48] sm:$0xff] %v792_v5  ;;  %v787_v7 = vadd.f32 %v1636_v48, %v786_v6 }
 0x222   :  { %v1240_v8 = vpop.f32.mrf.mxu1 }
 0x223   :  { %833 = vst [vmem:[#allocation14 + $0x40] sm:$0xff] %v787_v7  ;;  %v802_v9 = vadd.f32 %v1240_v8, %v1636_v48 }
 0x224   :  { %v796_v10 = vpop.f32.mrf.mxu1 }
 0x225   :  { %836 = vst [vmem:[#allocation14 + $0x58] sm:$0xff] %v802_v9  ;;  %v797_v11 = vadd.f32 %v1636_v48, %v796_v10 }
 0x226   :  { %v1243_v12 = vpop.f32.mrf.mxu1 }
 0x227   :  { %835 = vst [vmem:[#allocation14 + $0x50] sm:$0xff] %v797_v11  ;;  %v812_v13 = vadd.f32 %v1243_v12, %v1636_v48 }
 0x228   :  { %v806_v14 = vpop.f32.mrf.mxu1 }
 0x229   :  { %838 = vst [vmem:[#allocation14 + $0x68] sm:$0xff] %v812_v13  ;;  %v807_v15 = vadd.f32 %v1636_v48, %v806_v14 }
 0x22a   :  { %v1246_v16 = vpop.f32.mrf.mxu1 }
 0x22b   :  { %837 = vst [vmem:[#allocation14 + $0x60] sm:$0xff] %v807_v15  ;;  %v822_v17 = vadd.f32 %v1246_v16, %v1636_v48 }
 0x22c   :  { %v816_v18 = vpop.f32.mrf.mxu1 }
 0x22d   :  { %840 = vst [vmem:[#allocation14 + $0x78] sm:$0xff] %v822_v17  ;;  %v817_v19 = vadd.f32 %v1636_v48, %v816_v18 }
 0x22f   :  { %839 = vst [vmem:[#allocation14 + $0x70] sm:$0xff] %v817_v19 }
 0x230   :  { %1408 = shalt.err (!%p1405_p11)
}
 0x231   :  { %876 = dma.vmem_to_hbm [thread:$0]  %s871_s10, 2048, %s1685_s11, [#allocation13], %s1429_s22, %s1429_s22, %s1430_s23  }
 0x232   :  { %1423 = dma.done.wait [#allocation4], 2048  }
 0x233   :  { %1424 = vsyncadd [#allocation4], 4294965248 }
 0x234   :  { %1425 = dma.done.wait [#allocation13], 4096  }
 0x235   :  { %1426 = vsyncadd [#allocation13], 4294963200 }
 0x236   :  { %886 = vsyncpa [#allocation3], 1 }
 0x237   :  { %887 = vsyncpa [#allocation6], 1 }
 0x238   :  { %888 = vsyncpa [#allocation9], 1 }
 0x239   :  { %889 = vsyncpa [#allocation4], 1 }
 0x23a   :  { %890 = vsyncpa [#allocation13], 1 }

</bundles_post_ra>
